<compile_context>
chip_gen: v7x
topology: tpu7x:2x2x1
jax: 0.10.0
libtpu: 0.0.40
codegen_flags: <defaults>
</compile_context>

<pallas_src>
import jax
import jax.numpy as jnp
import numpy as np
from jax.experimental import pallas as pl
from jax.experimental.pallas import tpu as pltpu

_I32_MIN = -(2 ** 31)
_ID_PAD = _I32_MIN          # padding sentinel for id tables  (never equals a real key)
_SUB_PAD = _I32_MIN + 1     # padding sentinel for subsets    (never equals a real id)


def _round_up(x, m):
    return ((x + m - 1) // m) * m


def _make_kernel(nt_e, nt_p, tn, ksample):
    """Build the fused streaming-lookup + hierarchical-top-k kernel."""

    def kernel(
            # inputs (VMEM)
            e_scores_ref, e_ids_ref,          # (1, tn) f32 / i32, current entity tile
            p_scores_ref, p_ids_ref,          # (1, tn) f32 / i32, current predicate tile
            e_subset_ref, p_subset_ref,       # (m_e_pad, 1) / (m_p_pad, 1) i32, resident
            # outputs
            topk_idx_ref,                     # (k,) i32 in SMEM (scalar stores)
            e_out_ref, p_out_ref,             # (m_e_pad, 1) / (m_p_pad, 1) f32, carried
            # scratch
            e_bidx_ref, p_bidx_ref,           # (m, 1) i32 last-match global index carry
            scores2d_ref):                    # (nt_e, tn) f32 packed entity scores
        t = pl.program_id(0)
        nt = pl.num_programs(0)

        @pl.when(t == 0)
        def _init():
            e_bidx_ref[...] = jnp.full(e_bidx_ref.shape, -1, jnp.int32)
            p_bidx_ref[...] = jnp.full(p_bidx_ref.shape, -1, jnp.int32)
            e_out_ref[...] = jnp.zeros(e_out_ref.shape, jnp.float32)
            p_out_ref[...] = jnp.zeros(p_out_ref.shape, jnp.float32)

        # One global lane-index row per step, shared by both lookups (hoisted iota).
        lane = t * tn + jax.lax.broadcasted_iota(jnp.int32, (1, tn), 1)   # (1, tn)

        # ---- streaming look_up: carry (last_match_global_idx, score) per subset key
        def lookup_update(ids_tile, scores_tile, subset_col, bidx_ref, out_ref):
            match = subset_col == ids_tile                          # (m, tn)
            cand = jnp.where(match, lane, -1)                       # (m, tn)
            tile_best = jnp.max(cand, axis=1, keepdims=True)        # (m, 1) lane reduce
            tile_score = jnp.sum(jnp.where(lane == tile_best, scores_tile, 0.0),
                                 axis=1, keepdims=True)             # (m, 1) lane reduce
            newer = tile_best > bidx_ref[...]     # global idx => "last occurrence wins"
            out_ref[...] = jnp.where(newer, tile_score, out_ref[...])
            bidx_ref[...] = jnp.where(newer, tile_best, bidx_ref[...])

        @pl.when(t < nt_e)
        def _entity():
            # Stash this entity-score tile into the packed 2-D scratch for the top-k.
            scores2d_ref[pl.ds(t, 1), :] = e_scores_ref[...]
            lookup_update(e_ids_ref[...], e_scores_ref[...],
                          e_subset_ref[...], e_bidx_ref, e_out_ref)

        @pl.when(t < nt_p)
        def _predicate():
            lookup_update(p_ids_ref[...], p_scores_ref[...],
                          p_subset_ref[...], p_bidx_ref, p_out_ref)

        # ---- hierarchical top-k on the packed entity scores (last grid step only) ----
        @pl.when(t == nt - 1)
        def _topk():
            lane_iota = jax.lax.broadcasted_iota(jnp.int32, (1, tn), 1)      # (1, tn)
            row_iota = jax.lax.broadcasted_iota(jnp.int32, (nt_e, 1), 0)     # (nt_e, 1)
            # One pass over N for the per-tile row maxima; each extraction below only
            # touches the nt_e maxima plus a single tn-wide row.
            rmax = jnp.max(scores2d_ref[...], axis=1, keepdims=True)         # (nt_e, 1)
            for k in range(ksample):               # ksample small & static -> unrolled
                mv = jnp.max(rmax)                                           # padding=-inf
                r = jnp.min(jnp.where(rmax == mv, row_iota, nt_e))           # lowest row
                row = scores2d_ref[pl.ds(r, 1), :]                           # (1, tn)
                rm = jnp.max(row)
                c = jnp.min(jnp.where(row == rm, lane_iota, tn))             # lowest lane
                topk_idx_ref[k] = r * tn + c                                 # scalar store
                new_row = jnp.where(lane_iota == c, -jnp.inf, row)           # knock out
                scores2d_ref[pl.ds(r, 1), :] = new_row
                rmax = jnp.where(row_iota == r, jnp.max(new_row), rmax)

    return kernel


def sampling_layer_forward(e_scores, entity_ids, p_scores, predicate_ids,
                           s_entity_ids, s_predicate_ids, ksample, block_n=8192):
    n_e = int(e_scores.shape[0])
    n_p = int(p_scores.shape[0])
    m_e = int(s_entity_ids.shape[0])
    m_p = int(s_predicate_ids.shape[0])
    ksample = int(ksample)
    assert ksample <= n_e, "ksample must not exceed the number of real entity scores"

    block_n = _round_up(block_n, 128)
    tn = min(block_n, _round_up(max(n_e, n_p), 128))   # lane-dense tile width
    n_e_pad = _round_up(n_e, tn)
    n_p_pad = _round_up(n_p, tn)                       # per-table padding (review item)
    nt_e = n_e_pad // tn
    nt_p = n_p_pad // tn
    nt = max(nt_e, nt_p)
    assert n_e_pad < 2 ** 31 and n_p_pad < 2 ** 31     # int32 flat-index safety
    m_e_pad = _round_up(m_e, 8)
    m_p_pad = _round_up(m_p, 8)

    def pad_row(x, n, fill, dt):
        x = x.reshape(1, -1).astype(dt)
        return jnp.pad(x, ((0, 0), (0, n - x.shape[1])), constant_values=fill)

    def pad_col_i32(x, n, fill):
        x = x.reshape(-1, 1).astype(jnp.int32)
        return jnp.pad(x, ((0, n - x.shape[0]), (0, 0)), constant_values=fill)

    # Lane-dense (1, n_pad) tables. Entity score padding is -inf (top-k safe);
    # id padding is a sentinel no real subset key can equal.
    e_scores_row = pad_row(e_scores, n_e_pad, -jnp.inf, jnp.float32)
    e_ids_row = pad_row(entity_ids, n_e_pad, _ID_PAD, jnp.int32)
    p_scores_row = pad_row(p_scores, n_p_pad, 0.0, jnp.float32)
    p_ids_row = pad_row(predicate_ids, n_p_pad, _ID_PAD, jnp.int32)
    e_subset_col = pad_col_i32(s_entity_ids, m_e_pad, _SUB_PAD)
    p_subset_col = pad_col_i32(s_predicate_ids, m_p_pad, _SUB_PAD)

    # Clamped index maps: once the (smaller) table runs out of tiles the block index
    # stops changing, so Pallas does not re-issue its DMA; kernel work is pl.when-gated.
    e_tile = lambda i: (0, jnp.minimum(i, nt_e - 1))
    p_tile = lambda i: (0, jnp.minimum(i, nt_p - 1))
    resident = lambda i: (0, 0)                         # fetched/written once

    # VMEM budget: streamed (1, tn) blocks occupy 8*tn*4 B each (sublane padding) ->
    # 4 tables x 2 buffers x 8 x tn x 4 B = 256*tn B (2 MiB @ tn=8192); the O(N) item
    # is the scores2d scratch at n_e_pad*4 B. Scoped limit derived from physical VMEM.
    try:
        phys_vmem = int(getattr(pltpu.get_tpu_info(), "vmem_capacity_bytes",
                                64 * 1024 * 1024))
    except Exception:
        phys_vmem = 64 * 1024 * 1024                    # conservative (v7x per-TC)
    vmem_limit = int(max(32 * 1024 * 1024,
                         min(100 * 1024 * 1024, (phys_vmem * 3) // 4)))

    grid_spec = pltpu.PrefetchScalarGridSpec(
        num_scalar_prefetch=0,
        grid=(nt,),                                     # reduction axis over N tiles
        in_specs=[
            pl.BlockSpec((1, tn), e_tile),              # e_scores
            pl.BlockSpec((1, tn), e_tile),              # e_ids
            pl.BlockSpec((1, tn), p_tile),              # p_scores
            pl.BlockSpec((1, tn), p_tile),              # p_ids
            pl.BlockSpec((m_e_pad, 1), resident),       # entity subset
            pl.BlockSpec((m_p_pad, 1), resident),       # predicate subset
        ],
        out_specs=(
            pl.BlockSpec(memory_space=pltpu.MemorySpace.SMEM),   # top-k indices
            pl.BlockSpec((m_e_pad, 1), resident),                # e_scores look_up
            pl.BlockSpec((m_p_pad, 1), resident),                # p_scores look_up
        ),
        scratch_shapes=[
            pltpu.VMEM((m_e_pad, 1), jnp.int32),        # entity last-match idx carry
            pltpu.VMEM((m_p_pad, 1), jnp.int32),        # predicate last-match idx carry
            pltpu.VMEM((nt_e, tn), jnp.float32),        # packed entity scores for top-k
        ],
    )

    topk_idx, e_sub_pad, p_sub_pad = pl.pallas_call(
        _make_kernel(nt_e, nt_p, tn, ksample),
        grid_spec=grid_spec,
        out_shape=(
            jax.ShapeDtypeStruct((ksample,), jnp.int32),
            jax.ShapeDtypeStruct((m_e_pad, 1), jnp.float32),
            jax.ShapeDtypeStruct((m_p_pad, 1), jnp.float32),
        ),
        compiler_params=pltpu.CompilerParams(
            dimension_semantics=("arbitrary",),         # single grid axis is a reduction
            vmem_limit_bytes=vmem_limit,
        ),
    )(e_scores_row, e_ids_row, p_scores_row, p_ids_row,
      e_subset_col, p_subset_col)

    # k-element id gather in the wrapper (replaces the old full-table SMEM prefetch).
    sampled = jnp.asarray(entity_ids)[topk_idx]
    return sampled, topk_idx, e_sub_pad[:m_e], p_sub_pad[:m_p]


# ----------------------------------------------------------------------------
if __name__ == "__main__":
    key = jax.random.PRNGKey(0)
    k1, k2 = jax.random.split(key)

    N_E, N_P, KSAMPLE = 16, 8, 4

    e_scores = jax.random.normal(k1, (N_E, 1), dtype=jnp.float32)
    p_scores = jax.random.normal(k2, (N_P, 1), dtype=jnp.float32)
    entity_ids = jnp.arange(100, 100 + N_E, dtype=jnp.int32)       # global entity ids
    predicate_ids = jnp.arange(500, 500 + N_P, dtype=jnp.int32)    # global predicate ids

    # Synthetic "retrieved subgraph" subsets (would come from kg.compute_hops):
    # mixture of ids present in the tables and brand-new ids (-> default 0 score)
    s_entity_ids = jnp.array([103, 999, 100, 115, 777, 108, 101, 100, 300, 110],
                             dtype=jnp.int32)
    s_predicate_ids = jnp.array([501, 507, 888, 500, 505], dtype=jnp.int32)

    sampled, topk_idx, e_sub, p_sub = sampling_layer_forward(
        e_scores, entity_ids, p_scores, predicate_ids,
        s_entity_ids, s_predicate_ids, KSAMPLE)
    jax.block_until_ready((sampled, topk_idx, e_sub, p_sub))

    # --- reference check (pure numpy, mirrors the PyTorch semantics) ---
    es = np.asarray(e_scores).reshape(-1)
    ps = np.asarray(p_scores).reshape(-1)
    eid = np.asarray(entity_ids)
    pid = np.asarray(predicate_ids)

    order = np.argsort(-es, kind="stable")          # stable tie-break (lowest index)
    ref_sampled = eid[order[:KSAMPLE]]
    ref_idx = order[:KSAMPLE].astype(np.int32)

    def ref_lookup(ids, subset, scores):
        table = {int(k): i for i, k in enumerate(ids)}  # last occurrence wins
        out = np.zeros((len(subset), 1), dtype=np.float32)
        for j, s in enumerate(np.asarray(subset)):
            if int(s) in table:
                out[j, 0] = scores[table[int(s)]]
        return out

    ref_e = ref_lookup(eid, s_entity_ids, es)
    ref_p = ref_lookup(pid, s_predicate_ids, ps)

    assert np.array_equal(np.asarray(sampled), ref_sampled), (sampled, ref_sampled)
    assert np.array_equal(np.asarray(topk_idx), ref_idx), (topk_idx, ref_idx)
    np.testing.assert_allclose(np.asarray(e_sub), ref_e, rtol=1e-6, atol=1e-6)
    np.testing.assert_allclose(np.asarray(p_sub), ref_p, rtol=1e-6, atol=1e-6)

    print("KERNEL_OK")
</pallas_src>

<mosaic_0001>
module attributes {stable_mosaic.version = 11 : i64} {
  func.func @kernel(%arg0: i32, %arg1: memref<1x128xf32, #tpu.memory_space<vmem>>, %arg2: memref<1x128xi32, #tpu.memory_space<vmem>>, %arg3: memref<1x128xf32, #tpu.memory_space<vmem>>, %arg4: memref<1x128xi32, #tpu.memory_space<vmem>>, %arg5: memref<16x1xi32, #tpu.memory_space<vmem>>, %arg6: memref<8x1xi32, #tpu.memory_space<vmem>>, %arg7: memref<4xi32, #tpu.memory_space<smem>>, %arg8: memref<16x1xf32, #tpu.memory_space<vmem>>, %arg9: memref<8x1xf32, #tpu.memory_space<vmem>>, %arg10: memref<16x1xi32, #tpu.memory_space<vmem>>, %arg11: memref<8x1xi32, #tpu.memory_space<vmem>>, %arg12: memref<1x128xf32, #tpu.memory_space<vmem>>) attributes {dimension_semantics = [#tpu.dimension_semantics<arbitrary>], iteration_bounds = array<i64: 1>, scalar_prefetch = 0 : i64, scratch_operands = 3 : i64, tpu.core_type = #tpu.core_type<tc>, window_params = [{transform_indices = @transform_0, window_bounds = array<i64: 1, 128>}, {transform_indices = @transform_1, window_bounds = array<i64: 1, 128>}, {transform_indices = @transform_2, window_bounds = array<i64: 1, 128>}, {transform_indices = @transform_3, window_bounds = array<i64: 1, 128>}, {pipeline_mode = #tpu.pipeline_mode<synchronous>, transform_indices = @transform_4, window_bounds = array<i64: 16, 1>}, {pipeline_mode = #tpu.pipeline_mode<synchronous>, transform_indices = @transform_5, window_bounds = array<i64: 8, 1>}, {transform_indices = @transform_6, window_bounds = array<i64: 4>}, {pipeline_mode = #tpu.pipeline_mode<synchronous>, transform_indices = @transform_7, window_bounds = array<i64: 16, 1>}, {pipeline_mode = #tpu.pipeline_mode<synchronous>, transform_indices = @transform_8, window_bounds = array<i64: 8, 1>}]} {
    %c0_i32 = arith.constant 0 : i32
    %0 = arith.cmpi eq, %arg0, %c0_i32 : i32
    %1 = arith.extui %0 : i1 to i32
    %c0_i32_0 = arith.constant 0 : i32
    %2 = arith.cmpi ne, %1, %c0_i32_0 : i32
    scf.if %2 {
      %c-1_i32 = arith.constant -1 : i32
      %16 = vector.broadcast %c-1_i32 : i32 to vector<16x1xi32>
      %c0 = arith.constant 0 : index
      %c0_6 = arith.constant 0 : index
      %17 = vector.load %arg10[%c0, %c0_6] : memref<16x1xi32, #tpu.memory_space<vmem>>, vector<16x1xi32>
      tpu.vector_store %arg10[%c0, %c0_6], %16 {strides = array<i32>} : memref<16x1xi32, #tpu.memory_space<vmem>>, vector<16x1xi32>,
      %c-1_i32_7 = arith.constant -1 : i32
      %18 = vector.broadcast %c-1_i32_7 : i32 to vector<8x1xi32>
      %c0_8 = arith.constant 0 : index
      %c0_9 = arith.constant 0 : index
      %19 = vector.load %arg11[%c0_8, %c0_9] : memref<8x1xi32, #tpu.memory_space<vmem>>, vector<8x1xi32>
      tpu.vector_store %arg11[%c0_8, %c0_9], %18 {strides = array<i32>} : memref<8x1xi32, #tpu.memory_space<vmem>>, vector<8x1xi32>,
      %cst = arith.constant 0.000000e+00 : f32
      %20 = vector.broadcast %cst : f32 to vector<16x1xf32>
      %c0_10 = arith.constant 0 : index
      %c0_11 = arith.constant 0 : index
      %21 = vector.load %arg8[%c0_10, %c0_11] : memref<16x1xf32, #tpu.memory_space<vmem>>, vector<16x1xf32>
      tpu.vector_store %arg8[%c0_10, %c0_11], %20 {strides = array<i32>} : memref<16x1xf32, #tpu.memory_space<vmem>>, vector<16x1xf32>,
      %cst_12 = arith.constant 0.000000e+00 : f32
      %22 = vector.broadcast %cst_12 : f32 to vector<8x1xf32>
      %c0_13 = arith.constant 0 : index
      %c0_14 = arith.constant 0 : index
      %23 = vector.load %arg9[%c0_13, %c0_14] : memref<8x1xf32, #tpu.memory_space<vmem>>, vector<8x1xf32>
      tpu.vector_store %arg9[%c0_13, %c0_14], %22 {strides = array<i32>} : memref<8x1xf32, #tpu.memory_space<vmem>>, vector<8x1xf32>,
    } else {
    }
    %c128_i32 = arith.constant 128 : i32
    %3 = arith.muli %arg0, %c128_i32 : i32
    %4 = tpu.iota {dimensions = array<i32: 1>} : vector<1x128xi32>
    %5 = vector.broadcast %3 : i32 to vector<1x128xi32>
    %6 = arith.addi %5, %4 : vector<1x128xi32>
    %c1_i32 = arith.constant 1 : i32
    %7 = arith.cmpi slt, %arg0, %c1_i32 : i32
    %8 = arith.extui %7 : i1 to i32
    %c0_i32_1 = arith.constant 0 : i32
    %9 = arith.cmpi ne, %8, %c0_i32_1 : i32
    scf.if %9 {
      %c0 = arith.constant 0 : index
      %c0_6 = arith.constant 0 : index
      %16 = vector.load %arg1[%c0, %c0_6] : memref<1x128xf32, #tpu.memory_space<vmem>>, vector<1x128xf32>
      %17 = arith.index_cast %arg0 : i32 to index
      %c0_7 = arith.constant 0 : index
      %18 = vector.load %arg12[%17, %c0_7] : memref<1x128xf32, #tpu.memory_space<vmem>>, vector<1x128xf32>
      tpu.vector_store %arg12[%17, %c0_7], %16 {strides = array<i32>} : memref<1x128xf32, #tpu.memory_space<vmem>>, vector<1x128xf32>,
      %c0_8 = arith.constant 0 : index
      %c0_9 = arith.constant 0 : index
      %19 = vector.load %arg2[%c0_8, %c0_9] : memref<1x128xi32, #tpu.memory_space<vmem>>, vector<1x128xi32>
      %c0_10 = arith.constant 0 : index
      %c0_11 = arith.constant 0 : index
      %20 = vector.load %arg1[%c0_10, %c0_11] : memref<1x128xf32, #tpu.memory_space<vmem>>, vector<1x128xf32>
      %c0_12 = arith.constant 0 : index
      %c0_13 = arith.constant 0 : index
      %21 = vector.load %arg5[%c0_12, %c0_13] : memref<16x1xi32, #tpu.memory_space<vmem>>, vector<16x1xi32>
      %22 = vector.broadcast %21 : vector<16x1xi32> to vector<16x128xi32>
      %23 = vector.broadcast %19 : vector<1x128xi32> to vector<16x128xi32>
      %24 = arith.cmpi eq, %22, %23 : vector<16x128xi32>
      %c-1_i32 = arith.constant -1 : i32
      %25 = vector.shape_cast %6 : vector<1x128xi32> to vector<1x128xi32>
      %26 = vector.broadcast %25 : vector<1x128xi32> to vector<16x128xi32>
      %27 = vector.broadcast %c-1_i32 : i32 to vector<16x128xi32>
      %28 = arith.select %24, %26, %27 : vector<16x128xi1>, vector<16x128xi32>
      %cst = arith.constant dense<-2147483648> : vector<16xi32>
      %29 = vector.multi_reduction <maxsi>, %28, %cst [1] : vector<16x128xi32> to vector<16xi32>
      %30 = vector.shape_cast %29 : vector<16xi32> to vector<16x1xi32>
      %31 = vector.broadcast %6 : vector<1x128xi32> to vector<16x128xi32>
      %32 = vector.broadcast %30 : vector<16x1xi32> to vector<16x128xi32>
      %33 = arith.cmpi eq, %31, %32 : vector<16x128xi32>
      %cst_14 = arith.constant 0.000000e+00 : f32
      %34 = vector.shape_cast %20 : vector<1x128xf32> to vector<1x128xf32>
      %35 = vector.broadcast %34 : vector<1x128xf32> to vector<16x128xf32>
      %36 = vector.broadcast %cst_14 : f32 to vector<16x128xf32>
      %37 = arith.select %33, %35, %36 : vector<16x128xi1>, vector<16x128xf32>
      %cst_15 = arith.constant dense<0.000000e+00> : vector<16xf32>
      %38 = vector.multi_reduction <add>, %37, %cst_15 [1] : vector<16x128xf32> to vector<16xf32>
      %39 = vector.shape_cast %38 : vector<16xf32> to vector<16x1xf32>
      %c0_16 = arith.constant 0 : index
      %c0_17 = arith.constant 0 : index
      %40 = vector.load %arg10[%c0_16, %c0_17] : memref<16x1xi32, #tpu.memory_space<vmem>>, vector<16x1xi32>
      %41 = arith.cmpi sgt, %30, %40 : vector<16x1xi32>
      %c0_18 = arith.constant 0 : index
      %c0_19 = arith.constant 0 : index
      %42 = vector.load %arg8[%c0_18, %c0_19] : memref<16x1xf32, #tpu.memory_space<vmem>>, vector<16x1xf32>
      %43 = arith.select %41, %39, %42 : vector<16x1xi1>, vector<16x1xf32>
      %c0_20 = arith.constant 0 : index
      %c0_21 = arith.constant 0 : index
      %44 = vector.load %arg8[%c0_20, %c0_21] : memref<16x1xf32, #tpu.memory_space<vmem>>, vector<16x1xf32>
      tpu.vector_store %arg8[%c0_20, %c0_21], %43 {strides = array<i32>} : memref<16x1xf32, #tpu.memory_space<vmem>>, vector<16x1xf32>,
      %c0_22 = arith.constant 0 : index
      %c0_23 = arith.constant 0 : index
      %45 = vector.load %arg10[%c0_22, %c0_23] : memref<16x1xi32, #tpu.memory_space<vmem>>, vector<16x1xi32>
      %46 = arith.select %41, %30, %45 : vector<16x1xi1>, vector<16x1xi32>
      %c0_24 = arith.constant 0 : index
      %c0_25 = arith.constant 0 : index
      %47 = vector.load %arg10[%c0_24, %c0_25] : memref<16x1xi32, #tpu.memory_space<vmem>>, vector<16x1xi32>
      tpu.vector_store %arg10[%c0_24, %c0_25], %46 {strides = array<i32>} : memref<16x1xi32, #tpu.memory_space<vmem>>, vector<16x1xi32>,
    } else {
    }
    %c1_i32_2 = arith.constant 1 : i32
    %10 = arith.cmpi slt, %arg0, %c1_i32_2 : i32
    %11 = arith.extui %10 : i1 to i32
    %c0_i32_3 = arith.constant 0 : i32
    %12 = arith.cmpi ne, %11, %c0_i32_3 : i32
    scf.if %12 {
      %c0 = arith.constant 0 : index
      %c0_6 = arith.constant 0 : index
      %16 = vector.load %arg4[%c0, %c0_6] : memref<1x128xi32, #tpu.memory_space<vmem>>, vector<1x128xi32>
      %c0_7 = arith.constant 0 : index
      %c0_8 = arith.constant 0 : index
      %17 = vector.load %arg3[%c0_7, %c0_8] : memref<1x128xf32, #tpu.memory_space<vmem>>, vector<1x128xf32>
      %c0_9 = arith.constant 0 : index
      %c0_10 = arith.constant 0 : index
      %18 = vector.load %arg6[%c0_9, %c0_10] : memref<8x1xi32, #tpu.memory_space<vmem>>, vector<8x1xi32>
      %19 = vector.broadcast %18 : vector<8x1xi32> to vector<8x128xi32>
      %20 = vector.broadcast %16 : vector<1x128xi32> to vector<8x128xi32>
      %21 = arith.cmpi eq, %19, %20 : vector<8x128xi32>
      %c-1_i32 = arith.constant -1 : i32
      %22 = vector.shape_cast %6 : vector<1x128xi32> to vector<1x128xi32>
      %23 = vector.broadcast %22 : vector<1x128xi32> to vector<8x128xi32>
      %24 = vector.broadcast %c-1_i32 : i32 to vector<8x128xi32>
      %25 = arith.select %21, %23, %24 : vector<8x128xi1>, vector<8x128xi32>
      %cst = arith.constant dense<-2147483648> : vector<8xi32>
      %26 = vector.multi_reduction <maxsi>, %25, %cst [1] : vector<8x128xi32> to vector<8xi32>
      %27 = vector.shape_cast %26 : vector<8xi32> to vector<8x1xi32>
      %28 = vector.broadcast %6 : vector<1x128xi32> to vector<8x128xi32>
      %29 = vector.broadcast %27 : vector<8x1xi32> to vector<8x128xi32>
      %30 = arith.cmpi eq, %28, %29 : vector<8x128xi32>
      %cst_11 = arith.constant 0.000000e+00 : f32
      %31 = vector.shape_cast %17 : vector<1x128xf32> to vector<1x128xf32>
      %32 = vector.broadcast %31 : vector<1x128xf32> to vector<8x128xf32>
      %33 = vector.broadcast %cst_11 : f32 to vector<8x128xf32>
      %34 = arith.select %30, %32, %33 : vector<8x128xi1>, vector<8x128xf32>
      %cst_12 = arith.constant dense<0.000000e+00> : vector<8xf32>
      %35 = vector.multi_reduction <add>, %34, %cst_12 [1] : vector<8x128xf32> to vector<8xf32>
      %36 = vector.shape_cast %35 : vector<8xf32> to vector<8x1xf32>
      %c0_13 = arith.constant 0 : index
      %c0_14 = arith.constant 0 : index
      %37 = vector.load %arg11[%c0_13, %c0_14] : memref<8x1xi32, #tpu.memory_space<vmem>>, vector<8x1xi32>
      %38 = arith.cmpi sgt, %27, %37 : vector<8x1xi32>
      %c0_15 = arith.constant 0 : index
      %c0_16 = arith.constant 0 : index
      %39 = vector.load %arg9[%c0_15, %c0_16] : memref<8x1xf32, #tpu.memory_space<vmem>>, vector<8x1xf32>
      %40 = arith.select %38, %36, %39 : vector<8x1xi1>, vector<8x1xf32>
      %c0_17 = arith.constant 0 : index
      %c0_18 = arith.constant 0 : index
      %41 = vector.load %arg9[%c0_17, %c0_18] : memref<8x1xf32, #tpu.memory_space<vmem>>, vector<8x1xf32>
      tpu.vector_store %arg9[%c0_17, %c0_18], %40 {strides = array<i32>} : memref<8x1xf32, #tpu.memory_space<vmem>>, vector<8x1xf32>,
      %c0_19 = arith.constant 0 : index
      %c0_20 = arith.constant 0 : index
      %42 = vector.load %arg11[%c0_19, %c0_20] : memref<8x1xi32, #tpu.memory_space<vmem>>, vector<8x1xi32>
      %43 = arith.select %38, %27, %42 : vector<8x1xi1>, vector<8x1xi32>
      %c0_21 = arith.constant 0 : index
      %c0_22 = arith.constant 0 : index
      %44 = vector.load %arg11[%c0_21, %c0_22] : memref<8x1xi32, #tpu.memory_space<vmem>>, vector<8x1xi32>
      tpu.vector_store %arg11[%c0_21, %c0_22], %43 {strides = array<i32>} : memref<8x1xi32, #tpu.memory_space<vmem>>, vector<8x1xi32>,
    } else {
    }
    %c0_i32_4 = arith.constant 0 : i32
    %13 = arith.cmpi eq, %arg0, %c0_i32_4 : i32
    %14 = arith.extui %13 : i1 to i32
    %c0_i32_5 = arith.constant 0 : i32
    %15 = arith.cmpi ne, %14, %c0_i32_5 : i32
    scf.if %15 {
      %16 = tpu.iota {dimensions = array<i32: 1>} : vector<1x128xi32>
      %17 = tpu.iota {dimensions = array<i32: 0>} : vector<1x1xi32>
      %c0 = arith.constant 0 : index
      %c0_6 = arith.constant 0 : index
      %18 = vector.load %arg12[%c0, %c0_6] : memref<1x128xf32, #tpu.memory_space<vmem>>, vector<1x128xf32>
      %cst = arith.constant dense<0xFF800000> : vector<1xf32>
      %19 = vector.multi_reduction <maximumf>, %18, %cst [1] : vector<1x128xf32> to vector<1xf32>
      %20 = vector.shape_cast %19 : vector<1xf32> to vector<1x1xf32>
      %21 = vector.shape_cast %20 : vector<1x1xf32> to vector<1x1x1xf32>
      %cst_7 = arith.constant dense<0xFF800000> : vector<1xf32>
      %22 = vector.multi_reduction <maximumf>, %21, %cst_7 [1, 2] : vector<1x1x1xf32> to vector<1xf32>
      %23 = vector.shape_cast %22 : vector<1xf32> to vector<1x1x1xf32>
      %24 = vector.extract %23[0, 0, 0] : f32 from vector<1x1x1xf32>
      %25 = vector.broadcast %24 : f32 to vector<1x1xf32>
      %26 = arith.cmpf oeq, %20, %25 : vector<1x1xf32>
      %c1_i32_8 = arith.constant 1 : i32
      %27 = vector.broadcast %c1_i32_8 : i32 to vector<1x1xi32>
      %28 = arith.select %26, %17, %27 : vector<1x1xi1>, vector<1x1xi32>
      %29 = vector.shape_cast %28 : vector<1x1xi32> to vector<1x1x1xi32>
      %cst_9 = arith.constant dense<2147483647> : vector<1xi32>
      %30 = vector.multi_reduction <minsi>, %29, %cst_9 [1, 2] : vector<1x1x1xi32> to vector<1xi32>
      %31 = vector.shape_cast %30 : vector<1xi32> to vector<1x1x1xi32>
      %32 = vector.extract %31[0, 0, 0] : i32 from vector<1x1x1xi32>
      %33 = arith.index_cast %32 : i32 to index
      %c0_10 = arith.constant 0 : index
      %34 = vector.load %arg12[%33, %c0_10] : memref<1x128xf32, #tpu.memory_space<vmem>>, vector<1x128xf32>
      %35 = vector.shape_cast %34 : vector<1x128xf32> to vector<1x1x128xf32>
      %cst_11 = arith.constant dense<0xFF800000> : vector<1xf32>
      %36 = vector.multi_reduction <maximumf>, %35, %cst_11 [1, 2] : vector<1x1x128xf32> to vector<1xf32>
      %37 = vector.shape_cast %36 : vector<1xf32> to vector<1x1x1xf32>
      %38 = vector.extract %37[0, 0, 0] : f32 from vector<1x1x1xf32>
      %39 = vector.broadcast %38 : f32 to vector<1x128xf32>
      %40 = arith.cmpf oeq, %34, %39 : vector<1x128xf32>
      %c128_i32_12 = arith.constant 128 : i32
      %41 = vector.broadcast %c128_i32_12 : i32 to vector<1x128xi32>
      %42 = arith.select %40, %16, %41 : vector<1x128xi1>, vector<1x128xi32>
      %43 = vector.shape_cast %42 : vector<1x128xi32> to vector<1x1x128xi32>
      %cst_13 = arith.constant dense<2147483647> : vector<1xi32>
      %44 = vector.multi_reduction <minsi>, %43, %cst_13 [1, 2] : vector<1x1x128xi32> to vector<1xi32>
      %45 = vector.shape_cast %44 : vector<1xi32> to vector<1x1x1xi32>
      %46 = vector.extract %45[0, 0, 0] : i32 from vector<1x1x1xi32>
      %c128_i32_14 = arith.constant 128 : i32
      %47 = arith.muli %32, %c128_i32_14 : i32
      %48 = arith.addi %47, %46 : i32
      %c0_15 = arith.constant 0 : index
      %49 = memref.load %arg7[%c0_15] : memref<4xi32, #tpu.memory_space<smem>>
      memref.store %48, %arg7[%c0_15] : memref<4xi32, #tpu.memory_space<smem>>
      %50 = vector.broadcast %46 : i32 to vector<1x128xi32>
      %51 = arith.cmpi eq, %16, %50 : vector<1x128xi32>
      %cst_16 = arith.constant 0xFF800000 : f32
      %52 = vector.broadcast %cst_16 : f32 to vector<1x128xf32>
      %53 = arith.select %51, %52, %34 : vector<1x128xi1>, vector<1x128xf32>
      %54 = arith.index_cast %32 : i32 to index
      %c0_17 = arith.constant 0 : index
      %55 = vector.load %arg12[%54, %c0_17] : memref<1x128xf32, #tpu.memory_space<vmem>>, vector<1x128xf32>
      tpu.vector_store %arg12[%54, %c0_17], %53 {strides = array<i32>} : memref<1x128xf32, #tpu.memory_space<vmem>>, vector<1x128xf32>,
      %56 = vector.broadcast %32 : i32 to vector<1x1xi32>
      %57 = arith.cmpi eq, %17, %56 : vector<1x1xi32>
      %58 = vector.shape_cast %53 : vector<1x128xf32> to vector<1x1x128xf32>
      %cst_18 = arith.constant dense<0xFF800000> : vector<1xf32>
      %59 = vector.multi_reduction <maximumf>, %58, %cst_18 [1, 2] : vector<1x1x128xf32> to vector<1xf32>
      %60 = vector.shape_cast %59 : vector<1xf32> to vector<1x1x1xf32>
      %61 = vector.extract %60[0, 0, 0] : f32 from vector<1x1x1xf32>
      %62 = vector.broadcast %61 : f32 to vector<1x1xf32>
      %63 = arith.select %57, %62, %20 : vector<1x1xi1>, vector<1x1xf32>
      %64 = vector.shape_cast %63 : vector<1x1xf32> to vector<1x1x1xf32>
      %cst_19 = arith.constant dense<0xFF800000> : vector<1xf32>
      %65 = vector.multi_reduction <maximumf>, %64, %cst_19 [1, 2] : vector<1x1x1xf32> to vector<1xf32>
      %66 = vector.shape_cast %65 : vector<1xf32> to vector<1x1x1xf32>
      %67 = vector.extract %66[0, 0, 0] : f32 from vector<1x1x1xf32>
      %68 = vector.broadcast %67 : f32 to vector<1x1xf32>
      %69 = arith.cmpf oeq, %63, %68 : vector<1x1xf32>
      %c1_i32_20 = arith.constant 1 : i32
      %70 = vector.broadcast %c1_i32_20 : i32 to vector<1x1xi32>
      %71 = arith.select %69, %17, %70 : vector<1x1xi1>, vector<1x1xi32>
      %72 = vector.shape_cast %71 : vector<1x1xi32> to vector<1x1x1xi32>
      %cst_21 = arith.constant dense<2147483647> : vector<1xi32>
      %73 = vector.multi_reduction <minsi>, %72, %cst_21 [1, 2] : vector<1x1x1xi32> to vector<1xi32>
      %74 = vector.shape_cast %73 : vector<1xi32> to vector<1x1x1xi32>
      %75 = vector.extract %74[0, 0, 0] : i32 from vector<1x1x1xi32>
      %76 = arith.index_cast %75 : i32 to index
      %c0_22 = arith.constant 0 : index
      %77 = vector.load %arg12[%76, %c0_22] : memref<1x128xf32, #tpu.memory_space<vmem>>, vector<1x128xf32>
      %78 = vector.shape_cast %77 : vector<1x128xf32> to vector<1x1x128xf32>
      %cst_23 = arith.constant dense<0xFF800000> : vector<1xf32>
      %79 = vector.multi_reduction <maximumf>, %78, %cst_23 [1, 2] : vector<1x1x128xf32> to vector<1xf32>
      %80 = vector.shape_cast %79 : vector<1xf32> to vector<1x1x1xf32>
      %81 = vector.extract %80[0, 0, 0] : f32 from vector<1x1x1xf32>
      %82 = vector.broadcast %81 : f32 to vector<1x128xf32>
      %83 = arith.cmpf oeq, %77, %82 : vector<1x128xf32>
      %c128_i32_24 = arith.constant 128 : i32
      %84 = vector.broadcast %c128_i32_24 : i32 to vector<1x128xi32>
      %85 = arith.select %83, %16, %84 : vector<1x128xi1>, vector<1x128xi32>
      %86 = vector.shape_cast %85 : vector<1x128xi32> to vector<1x1x128xi32>
      %cst_25 = arith.constant dense<2147483647> : vector<1xi32>
      %87 = vector.multi_reduction <minsi>, %86, %cst_25 [1, 2] : vector<1x1x128xi32> to vector<1xi32>
      %88 = vector.shape_cast %87 : vector<1xi32> to vector<1x1x1xi32>
      %89 = vector.extract %88[0, 0, 0] : i32 from vector<1x1x1xi32>
      %c128_i32_26 = arith.constant 128 : i32
      %90 = arith.muli %75, %c128_i32_26 : i32
      %91 = arith.addi %90, %89 : i32
      %c1 = arith.constant 1 : index
      %92 = memref.load %arg7[%c1] : memref<4xi32, #tpu.memory_space<smem>>
      memref.store %91, %arg7[%c1] : memref<4xi32, #tpu.memory_space<smem>>
      %93 = vector.broadcast %89 : i32 to vector<1x128xi32>
      %94 = arith.cmpi eq, %16, %93 : vector<1x128xi32>
      %cst_27 = arith.constant 0xFF800000 : f32
      %95 = vector.broadcast %cst_27 : f32 to vector<1x128xf32>
      %96 = arith.select %94, %95, %77 : vector<1x128xi1>, vector<1x128xf32>
      %97 = arith.index_cast %75 : i32 to index
      %c0_28 = arith.constant 0 : index
      %98 = vector.load %arg12[%97, %c0_28] : memref<1x128xf32, #tpu.memory_space<vmem>>, vector<1x128xf32>
      tpu.vector_store %arg12[%97, %c0_28], %96 {strides = array<i32>} : memref<1x128xf32, #tpu.memory_space<vmem>>, vector<1x128xf32>,
      %99 = vector.broadcast %75 : i32 to vector<1x1xi32>
      %100 = arith.cmpi eq, %17, %99 : vector<1x1xi32>
      %101 = vector.shape_cast %96 : vector<1x128xf32> to vector<1x1x128xf32>
      %cst_29 = arith.constant dense<0xFF800000> : vector<1xf32>
      %102 = vector.multi_reduction <maximumf>, %101, %cst_29 [1, 2] : vector<1x1x128xf32> to vector<1xf32>
      %103 = vector.shape_cast %102 : vector<1xf32> to vector<1x1x1xf32>
      %104 = vector.extract %103[0, 0, 0] : f32 from vector<1x1x1xf32>
      %105 = vector.broadcast %104 : f32 to vector<1x1xf32>
      %106 = arith.select %100, %105, %63 : vector<1x1xi1>, vector<1x1xf32>
      %107 = vector.shape_cast %106 : vector<1x1xf32> to vector<1x1x1xf32>
      %cst_30 = arith.constant dense<0xFF800000> : vector<1xf32>
      %108 = vector.multi_reduction <maximumf>, %107, %cst_30 [1, 2] : vector<1x1x1xf32> to vector<1xf32>
      %109 = vector.shape_cast %108 : vector<1xf32> to vector<1x1x1xf32>
      %110 = vector.extract %109[0, 0, 0] : f32 from vector<1x1x1xf32>
      %111 = vector.broadcast %110 : f32 to vector<1x1xf32>
      %112 = arith.cmpf oeq, %106, %111 : vector<1x1xf32>
      %c1_i32_31 = arith.constant 1 : i32
      %113 = vector.broadcast %c1_i32_31 : i32 to vector<1x1xi32>
      %114 = arith.select %112, %17, %113 : vector<1x1xi1>, vector<1x1xi32>
      %115 = vector.shape_cast %114 : vector<1x1xi32> to vector<1x1x1xi32>
      %cst_32 = arith.constant dense<2147483647> : vector<1xi32>
      %116 = vector.multi_reduction <minsi>, %115, %cst_32 [1, 2] : vector<1x1x1xi32> to vector<1xi32>
      %117 = vector.shape_cast %116 : vector<1xi32> to vector<1x1x1xi32>
      %118 = vector.extract %117[0, 0, 0] : i32 from vector<1x1x1xi32>
      %119 = arith.index_cast %118 : i32 to index
      %c0_33 = arith.constant 0 : index
      %120 = vector.load %arg12[%119, %c0_33] : memref<1x128xf32, #tpu.memory_space<vmem>>, vector<1x128xf32>
      %121 = vector.shape_cast %120 : vector<1x128xf32> to vector<1x1x128xf32>
      %cst_34 = arith.constant dense<0xFF800000> : vector<1xf32>
      %122 = vector.multi_reduction <maximumf>, %121, %cst_34 [1, 2] : vector<1x1x128xf32> to vector<1xf32>
      %123 = vector.shape_cast %122 : vector<1xf32> to vector<1x1x1xf32>
      %124 = vector.extract %123[0, 0, 0] : f32 from vector<1x1x1xf32>
      %125 = vector.broadcast %124 : f32 to vector<1x128xf32>
      %126 = arith.cmpf oeq, %120, %125 : vector<1x128xf32>
      %c128_i32_35 = arith.constant 128 : i32
      %127 = vector.broadcast %c128_i32_35 : i32 to vector<1x128xi32>
      %128 = arith.select %126, %16, %127 : vector<1x128xi1>, vector<1x128xi32>
      %129 = vector.shape_cast %128 : vector<1x128xi32> to vector<1x1x128xi32>
      %cst_36 = arith.constant dense<2147483647> : vector<1xi32>
      %130 = vector.multi_reduction <minsi>, %129, %cst_36 [1, 2] : vector<1x1x128xi32> to vector<1xi32>
      %131 = vector.shape_cast %130 : vector<1xi32> to vector<1x1x1xi32>
      %132 = vector.extract %131[0, 0, 0] : i32 from vector<1x1x1xi32>
      %c128_i32_37 = arith.constant 128 : i32
      %133 = arith.muli %118, %c128_i32_37 : i32
      %134 = arith.addi %133, %132 : i32
      %c2 = arith.constant 2 : index
      %135 = memref.load %arg7[%c2] : memref<4xi32, #tpu.memory_space<smem>>
      memref.store %134, %arg7[%c2] : memref<4xi32, #tpu.memory_space<smem>>
      %136 = vector.broadcast %132 : i32 to vector<1x128xi32>
      %137 = arith.cmpi eq, %16, %136 : vector<1x128xi32>
      %cst_38 = arith.constant 0xFF800000 : f32
      %138 = vector.broadcast %cst_38 : f32 to vector<1x128xf32>
      %139 = arith.select %137, %138, %120 : vector<1x128xi1>, vector<1x128xf32>
      %140 = arith.index_cast %118 : i32 to index
      %c0_39 = arith.constant 0 : index
      %141 = vector.load %arg12[%140, %c0_39] : memref<1x128xf32, #tpu.memory_space<vmem>>, vector<1x128xf32>
      tpu.vector_store %arg12[%140, %c0_39], %139 {strides = array<i32>} : memref<1x128xf32, #tpu.memory_space<vmem>>, vector<1x128xf32>,
      %142 = vector.broadcast %118 : i32 to vector<1x1xi32>
      %143 = arith.cmpi eq, %17, %142 : vector<1x1xi32>
      %144 = vector.shape_cast %139 : vector<1x128xf32> to vector<1x1x128xf32>
      %cst_40 = arith.constant dense<0xFF800000> : vector<1xf32>
      %145 = vector.multi_reduction <maximumf>, %144, %cst_40 [1, 2] : vector<1x1x128xf32> to vector<1xf32>
      %146 = vector.shape_cast %145 : vector<1xf32> to vector<1x1x1xf32>
      %147 = vector.extract %146[0, 0, 0] : f32 from vector<1x1x1xf32>
      %148 = vector.broadcast %147 : f32 to vector<1x1xf32>
      %149 = arith.select %143, %148, %106 : vector<1x1xi1>, vector<1x1xf32>
      %150 = vector.shape_cast %149 : vector<1x1xf32> to vector<1x1x1xf32>
      %cst_41 = arith.constant dense<0xFF800000> : vector<1xf32>
      %151 = vector.multi_reduction <maximumf>, %150, %cst_41 [1, 2] : vector<1x1x1xf32> to vector<1xf32>
      %152 = vector.shape_cast %151 : vector<1xf32> to vector<1x1x1xf32>
      %153 = vector.extract %152[0, 0, 0] : f32 from vector<1x1x1xf32>
      %154 = vector.broadcast %153 : f32 to vector<1x1xf32>
      %155 = arith.cmpf oeq, %149, %154 : vector<1x1xf32>
      %c1_i32_42 = arith.constant 1 : i32
      %156 = vector.broadcast %c1_i32_42 : i32 to vector<1x1xi32>
      %157 = arith.select %155, %17, %156 : vector<1x1xi1>, vector<1x1xi32>
      %158 = vector.shape_cast %157 : vector<1x1xi32> to vector<1x1x1xi32>
      %cst_43 = arith.constant dense<2147483647> : vector<1xi32>
      %159 = vector.multi_reduction <minsi>, %158, %cst_43 [1, 2] : vector<1x1x1xi32> to vector<1xi32>
      %160 = vector.shape_cast %159 : vector<1xi32> to vector<1x1x1xi32>
      %161 = vector.extract %160[0, 0, 0] : i32 from vector<1x1x1xi32>
      %162 = arith.index_cast %161 : i32 to index
      %c0_44 = arith.constant 0 : index
      %163 = vector.load %arg12[%162, %c0_44] : memref<1x128xf32, #tpu.memory_space<vmem>>, vector<1x128xf32>
      %164 = vector.shape_cast %163 : vector<1x128xf32> to vector<1x1x128xf32>
      %cst_45 = arith.constant dense<0xFF800000> : vector<1xf32>
      %165 = vector.multi_reduction <maximumf>, %164, %cst_45 [1, 2] : vector<1x1x128xf32> to vector<1xf32>
      %166 = vector.shape_cast %165 : vector<1xf32> to vector<1x1x1xf32>
      %167 = vector.extract %166[0, 0, 0] : f32 from vector<1x1x1xf32>
      %168 = vector.broadcast %167 : f32 to vector<1x128xf32>
      %169 = arith.cmpf oeq, %163, %168 : vector<1x128xf32>
      %c128_i32_46 = arith.constant 128 : i32
      %170 = vector.broadcast %c128_i32_46 : i32 to vector<1x128xi32>
      %171 = arith.select %169, %16, %170 : vector<1x128xi1>, vector<1x128xi32>
      %172 = vector.shape_cast %171 : vector<1x128xi32> to vector<1x1x128xi32>
      %cst_47 = arith.constant dense<2147483647> : vector<1xi32>
      %173 = vector.multi_reduction <minsi>, %172, %cst_47 [1, 2] : vector<1x1x128xi32> to vector<1xi32>
      %174 = vector.shape_cast %173 : vector<1xi32> to vector<1x1x1xi32>
      %175 = vector.extract %174[0, 0, 0] : i32 from vector<1x1x1xi32>
      %c128_i32_48 = arith.constant 128 : i32
      %176 = arith.muli %161, %c128_i32_48 : i32
      %177 = arith.addi %176, %175 : i32
      %c3 = arith.constant 3 : index
      %178 = memref.load %arg7[%c3] : memref<4xi32, #tpu.memory_space<smem>>
      memref.store %177, %arg7[%c3] : memref<4xi32, #tpu.memory_space<smem>>
      %179 = vector.broadcast %175 : i32 to vector<1x128xi32>
      %180 = arith.cmpi eq, %16, %179 : vector<1x128xi32>
      %cst_49 = arith.constant 0xFF800000 : f32
      %181 = vector.broadcast %cst_49 : f32 to vector<1x128xf32>
      %182 = arith.select %180, %181, %163 : vector<1x128xi1>, vector<1x128xf32>
      %183 = arith.index_cast %161 : i32 to index
      %c0_50 = arith.constant 0 : index
      %184 = vector.load %arg12[%183, %c0_50] : memref<1x128xf32, #tpu.memory_space<vmem>>, vector<1x128xf32>
      tpu.vector_store %arg12[%183, %c0_50], %182 {strides = array<i32>} : memref<1x128xf32, #tpu.memory_space<vmem>>, vector<1x128xf32>,
    } else {
    }
    return
  }
  func.func @transform_0(%arg0: i32) -> (i32, i32) {
    %c0_i32 = arith.constant 0 : i32
    %0 = arith.minsi %arg0, %c0_i32 : i32
    %c0_i32_0 = arith.constant 0 : i32
    %c0_i32_1 = arith.constant 0 : i32
    return %c0_i32_0, %0 : i32, i32
  }
  func.func @transform_1(%arg0: i32) -> (i32, i32) {
    %c0_i32 = arith.constant 0 : i32
    %0 = arith.minsi %arg0, %c0_i32 : i32
    %c0_i32_0 = arith.constant 0 : i32
    %c0_i32_1 = arith.constant 0 : i32
    return %c0_i32_0, %0 : i32, i32
  }
  func.func @transform_2(%arg0: i32) -> (i32, i32) {
    %c0_i32 = arith.constant 0 : i32
    %0 = arith.minsi %arg0, %c0_i32 : i32
    %c0_i32_0 = arith.constant 0 : i32
    %c0_i32_1 = arith.constant 0 : i32
    return %c0_i32_0, %0 : i32, i32
  }
  func.func @transform_3(%arg0: i32) -> (i32, i32) {
    %c0_i32 = arith.constant 0 : i32
    %0 = arith.minsi %arg0, %c0_i32 : i32
    %c0_i32_0 = arith.constant 0 : i32
    %c0_i32_1 = arith.constant 0 : i32
    return %c0_i32_0, %0 : i32, i32
  }
  func.func @transform_4(%arg0: i32) -> (i32, i32) {
    %c0_i32 = arith.constant 0 : i32
    %c0_i32_0 = arith.constant 0 : i32
    %c0_i32_1 = arith.constant 0 : i32
    return %c0_i32, %c0_i32_0 : i32, i32
  }
  func.func @transform_5(%arg0: i32) -> (i32, i32) {
    %c0_i32 = arith.constant 0 : i32
    %c0_i32_0 = arith.constant 0 : i32
    %c0_i32_1 = arith.constant 0 : i32
    return %c0_i32, %c0_i32_0 : i32, i32
  }
  func.func @transform_6(%arg0: i32) -> i32 {
    %c0_i32 = arith.constant 0 : i32
    %c0_i32_0 = arith.constant 0 : i32
    return %c0_i32 : i32
  }
  func.func @transform_7(%arg0: i32) -> (i32, i32) {
    %c0_i32 = arith.constant 0 : i32
    %c0_i32_0 = arith.constant 0 : i32
    %c0_i32_1 = arith.constant 0 : i32
    return %c0_i32, %c0_i32_0 : i32, i32
  }
  func.func @transform_8(%arg0: i32) -> (i32, i32) {
    %c0_i32 = arith.constant 0 : i32
    %c0_i32_0 = arith.constant 0 : i32
    %c0_i32_1 = arith.constant 0 : i32
    return %c0_i32, %c0_i32_0 : i32, i32
  }
}

</mosaic_0001>

<bundles_post_ra>
// kernel: tpu_custom_call.1
= control target key start
LH: loop header
LB: loop body
LE: loop exit
PB: predicated region body
PF: predicated region fallthrough
CT: control target
= control target key end

     0   :  { %s745_s0 = inlined_call_operand.vmem [shape: f32[1,128], index: 0, kind: input, shape index: {}]   ;;  %s746_s1 = inlined_call_operand.vmem [shape: s32[1,128], index: 1, kind: input, shape index: {}]   ;;  %s747_s2 = inlined_call_operand.vmem [shape: f32[1,128], index: 2, kind: input, shape index: {}]   ;;  %s748_s3 = inlined_call_operand.vmem [shape: s32[1,128], index: 3, kind: input, shape index: {}]   ;;  %s749_s4 = inlined_call_operand.vmem [shape: s32[16,1], index: 4, kind: input, shape index: {}]   ;;  %s750_s5 = inlined_call_operand.vmem [shape: s32[8,1], index: 5, kind: input, shape index: {}]   ;;  %s751_s6 = inlined_call_operand.hbm [shape: s32[4], index: 6, kind: output, shape index: {0}]   ;;  %s752_s7 = inlined_call_operand.vmem [shape: f32[16,1], index: 7, kind: output, shape index: {1}]   ;;  %s753_s8 = inlined_call_operand.vmem [shape: f32[8,1], index: 8, kind: output, shape index: {2}]  }
   0x1   :  { %v47_v0 = vld [vmem:[%s745_s0] sm:$0x1] }
   0x2   :  { %14 = vsyncpa [#allocation6], 0  ;;  %48 = vst [vmem:[#allocation4] sm:$0x1] %v47_v0  ;;  %vm176_vm0 = vcmask 1040384   ;;  %v39_v4 = vlaneseq }
   0x4   :  { %v579_v5 = vshrl.u32 %v39_v4, 7  ;;  %v589_v17 = vand.u32 127, %v39_v4 }
   0x9   :  { %v175_v1 = vld [vmem:[#allocation4] sm:$0x1] }
   0xa   :  { %v177_v2 = vsel %vm176_vm0, %v175_v1, -inf }
   0xb   :  { %178 = vmax.xlane.f32.xlu0 %v177_v2 }
  0x98   :  { %v576_v3 = vpop.xlane.xlu0 %178 }
  0x99   :  { %467 = vpush %v576_v3 }
  0xca   :  { %s468_s29 = spop %467 }
  0xcb   :  { %v181_v6 = vstv %s468_s29 }
  0xcc   :  { %vm182_vm1 = vcmp.eq.f32.partialorder %v576_v3, %v181_v6 }
  0xcd   :  { %v183_v7 = vsel %vm182_vm1, %v579_v5, 1 }
  0xce   :  { %469 = vpush %v183_v7 }
  0xff   :  { %s583_s30 = spop %469 }
 0x100   :  { %s185_s9 = scalar_lea.vmem [#allocation4], %s583_s30  ;;  %s463_s12 = sshll.u32 %s583_s30, 7  ;;  %v233_v48 = vstv %s583_s30 }
 0x101   :  { %v186_v8 = vld [vmem:[%s185_s9] sm:$0x1]  ;;  %vm234_vm8 = vcmp.eq.s32.totalorder %v579_v5, %v233_v48 }
 0x102   :  { %v187_v9 = vsel %vm176_vm0, %v186_v8, -inf }
 0x103   :  { %188 = vmax.xlane.f32.xlu0 %v187_v9 }
 0x190   :  { %v189_v10 = vpop.xlane.xlu0 %188 }
 0x191   :  { %v190_v11 = vrot.slane %v189_v10, 4 }
 0x193   :  { %v191_v12 = vmax.f32 %v189_v10, %v190_v11 }
 0x195   :  { %v192_v13 = vrot.slane %v191_v12, 2 }
 0x197   :  { %v193_v14 = vmax.f32 %v191_v12, %v192_v13 }
 0x199   :  { %v194_v15 = vrot.slane %v193_v14, 1 }
 0x19b   :  { %v195_v16 = vmax.f32 %v193_v14, %v194_v15 }
 0x19d   :  { %471 = vpush %v195_v16 }
 0x1ce   :  { %s472_s10 = spop %471 }
 0x1cf   :  { %v197_v18 = vstv %s472_s10 }
 0x1d0   :  { %vm198_vm2 = vcmp.eq.f32.partialorder %v186_v8, %v197_v18 }
 0x1d1   :  { %v199_v19 = vsel %vm198_vm2, %v589_v17, 128 }
 0x1d2   :  { %v200_v20 = vsel %vm176_vm0, %v199_v19, 2147483647 }
 0x1d3   :  { %v202_v21 = vshra.s32 %v200_v20, 16  ;;  %v201_v23 = vand.u32 65535, %v200_v20 }
 0x1d5   :  { %v204_v22 = vcvt.s32.f32 %v202_v21  ;;  %v203_v25 = vcvt.s32.f32 %v201_v23 }
 0x1d7   :  { %205 = vmin.xlane.f32.xlu1 %v204_v22 }
 0x264   :  { %v206_v24 = vpop.xlane.xlu1 %205 }
 0x265   :  { %vm207_vm3 = vcmp.eq.f32.partialorder %v204_v22, %v206_v24  ;;  %v212_v27 = vcvt.f32.s32 %v206_v24 }
 0x266   :  { %v208_v26 = vsel %vm207_vm3, %v203_v25, inf }
 0x267   :  { %209 = vmin.xlane.f32.xlu1 %v208_v26  ;;  %v213_v29 = vshll.u32 %v212_v27, 16 }
 0x2f4   :  { %v210_v28 = vpop.xlane.xlu1 %209 }
 0x2f5   :  { %v211_v30 = vcvt.f32.s32 %v210_v28 }
 0x2f7   :  { %v214_v31 = vadd.s32 %v213_v29, %v211_v30 }
 0x2f9   :  { %v215_v32 = vrot.slane %v214_v31, 4 }
 0x2fb   :  { %vm216_vm4 = vcmp.lt.s32.totalorder %v214_v31, %v215_v32 }
 0x2fc   :  { %v217_v33 = vsel %vm216_vm4, %v214_v31, %v215_v32 }
 0x2fd   :  { %v218_v34 = vrot.slane %v217_v33, 2 }
 0x2ff   :  { %vm219_vm5 = vcmp.lt.s32.totalorder %v217_v33, %v218_v34 }
 0x300   :  { %v220_v35 = vsel %vm219_vm5, %v217_v33, %v218_v34 }
 0x301   :  { %v221_v36 = vrot.slane %v220_v35, 1 }
 0x303   :  { %vm222_vm6 = vcmp.lt.s32.totalorder %v220_v35, %v221_v36 }
 0x304   :  { %v223_v37 = vsel %vm222_vm6, %v220_v35, %v221_v36 }
 0x305   :  { %473 = vpush %v223_v37 }
 0x336   :  { %s474_s11 = spop %473 }
 0x337   :  { %s226_s13 = sadd.s32 %s474_s11, %s463_s12  ;;  %v229_v38 = vstv %s474_s11 }
 0x338   :  { %228 = sst [smem:[#allocation5]] %s226_s13  ;;  %vm230_vm7 = vcmp.eq.s32.totalorder %v589_v17, %v229_v38 }
 0x339   :  { %v231_v39 = vsel %vm230_vm7, -inf, %v186_v8 }
 0x33a   :  { %v235_v40 = vsel %vm176_vm0, %v231_v39, -inf  ;;  %232 = vst [vmem:[%s185_s9] sm:$0x1] %v231_v39 }
 0x33b   :  { %236 = vmax.xlane.f32.xlu0 %v235_v40 }
 0x3c8   :  { %v237_v41 = vpop.xlane.xlu0 %236 }
 0x3c9   :  { %v238_v42 = vrot.slane %v237_v41, 4 }
 0x3cb   :  { %v239_v43 = vmax.f32 %v237_v41, %v238_v42 }
 0x3cd   :  { %v240_v44 = vrot.slane %v239_v43, 2 }
 0x3cf   :  { %v241_v45 = vmax.f32 %v239_v43, %v240_v44 }
 0x3d1   :  { %v242_v46 = vrot.slane %v241_v45, 1 }
 0x3d3   :  { %v243_v47 = vmax.f32 %v241_v45, %v242_v46 }
 0x3d5   :  { %475 = vpush %v243_v47 }
 0x406   :  { %s476_s14 = spop %475 }
 0x407   :  { %v245_v49 = vstv %s476_s14 }
 0x408   :  { %v601_v50 = vsel %vm234_vm8, %v245_v49, %v576_v3 }
 0x409   :  { %477 = vpush %v601_v50 }
 0x43a   :  { %s478_s15 = spop %477 }
 0x43b   :  { %v248_v51 = vstv %s478_s15 }
 0x43c   :  { %vm249_vm9 = vcmp.eq.f32.partialorder %v601_v50, %v248_v51 }
 0x43d   :  { %v250_v52 = vsel %vm249_vm9, %v579_v5, 1 }
 0x43e   :  { %479 = vpush %v250_v52 }
 0x46f   :  { %s606_s16 = spop %479 }
 0x470   :  { %s252_s17 = scalar_lea.vmem [#allocation4], %s606_s16  ;;  %s464_s20 = sshll.u32 %s606_s16, 7  ;;  %v300_v30 = vstv %s606_s16 }
 0x471   :  { %v253_v53 = vld [vmem:[%s252_s17] sm:$0x1]  ;;  %vm301_vm1 = vcmp.eq.s32.totalorder %v579_v5, %v300_v30  ;;  %s511_s16 = scalar_lea.hbm %s751_s6, 16 }
 0x472   :  { %v254_v54 = vsel %vm176_vm0, %v253_v53, -inf  ;;  %p512_p0 = scmp.ne.s32.totalorder %s751_s6, %s511_s16  ;;  %p515_p1 = scmp.lt.u32.totalorder %s511_s16, %s751_s6 }
 0x473   :  { %255 = vmax.xlane.f32.xlu1 %v254_v54 }
 0x474   :  { %p517_p2 = pnand %p515_p1, %p512_p0 }
 0x500   :  { %v256_v55 = vpop.xlane.xlu1 %255 }
 0x501   :  { %v257_v56 = vrot.slane %v256_v55, 4 }
 0x503   :  { %v258_v57 = vmax.f32 %v256_v55, %v257_v56 }
 0x505   :  { %v259_v58 = vrot.slane %v258_v57, 2 }
 0x507   :  { %v260_v59 = vmax.f32 %v258_v57, %v259_v58 }
 0x509   :  { %v261_v60 = vrot.slane %v260_v59, 1 }
 0x50b   :  { %v262_v61 = vmax.f32 %v260_v59, %v261_v60 }
 0x50d   :  { %481 = vpush %v262_v61 }
 0x53e   :  { %s482_s18 = spop %481 }
 0x53f   :  { %v264_v62 = vstv %s482_s18 }
 0x540   :  { %vm265_vm10 = vcmp.eq.f32.partialorder %v253_v53, %v264_v62 }
 0x541   :  { %v266_v63 = vsel %vm265_vm10, %v589_v17, 128 }
 0x542   :  { %v267_v0 = vsel %vm176_vm0, %v266_v63, 2147483647 }
 0x543   :  { %v269_v1 = vshra.s32 %v267_v0, 16  ;;  %v268_v3 = vand.u32 65535, %v267_v0 }
 0x545   :  { %v271_v2 = vcvt.s32.f32 %v269_v1  ;;  %v270_v6 = vcvt.s32.f32 %v268_v3  ;;  %v51_v3 = vld [vmem:[%s749_s4] sm:$0xff] }
 0x547   :  { %272 = vmin.xlane.f32.xlu0 %v271_v2 }
 0x5d4   :  { %v273_v4 = vpop.xlane.xlu0 %272 }
 0x5d5   :  { %vm274_vm11 = vcmp.eq.f32.partialorder %v271_v2, %v273_v4  ;;  %v279_v8 = vcvt.f32.s32 %v273_v4  ;;  %v523_v4 = vmov 0  }
 0x5d6   :  { %v275_v7 = vsel %vm274_vm11, %v270_v6, inf  ;;  %509 = vset.pattern.permute.xlu0 %v523_v4  ;;  %510 = vset.pattern.permute.xlu1 %v523_v4 }
 0x5d7   :  { %276 = vmin.xlane.f32.xlu1 %v275_v7  ;;  %v280_v10 = vshll.u32 %v279_v8, 16 }
 0x664   :  { %v277_v9 = vpop.xlane.xlu1 %276 }
 0x665   :  { %v278_v11 = vcvt.f32.s32 %v277_v9 }
 0x667   :  { %v281_v12 = vadd.s32 %v280_v10, %v278_v11 }
 0x669   :  { %v282_v13 = vrot.slane %v281_v12, 4 }
 0x66b   :  { %vm283_vm12 = vcmp.lt.s32.totalorder %v281_v12, %v282_v13 }
 0x66c   :  { %v284_v14 = vsel %vm283_vm12, %v281_v12, %v282_v13 }
 0x66d   :  { %v285_v15 = vrot.slane %v284_v14, 2 }
 0x66f   :  { %vm286_vm13 = vcmp.lt.s32.totalorder %v284_v14, %v285_v15 }
 0x670   :  { %v287_v16 = vsel %vm286_vm13, %v284_v14, %v285_v15 }
 0x671   :  { %v288_v18 = vrot.slane %v287_v16, 1 }
 0x673   :  { %vm289_vm14 = vcmp.lt.s32.totalorder %v287_v16, %v288_v18 }
 0x674   :  { %v290_v19 = vsel %vm289_vm14, %v287_v16, %v288_v18 }
 0x675   :  { %483 = vpush %v290_v19 }
 0x6a6   :  { %s484_s19 = spop %483 }
 0x6a7   :  { %s293_s21 = sadd.s32 %s484_s19, %s464_s20  ;;  %v296_v20 = vstv %s484_s19 }
 0x6a8   :  { %295 = sst [smem:[#allocation5 + $0x1]] %s293_s21  ;;  %vm297_vm15 = vcmp.eq.s32.totalorder %v589_v17, %v296_v20 }
 0x6a9   :  { %v298_v21 = vsel %vm297_vm15, -inf, %v253_v53 }
 0x6aa   :  { %v302_v22 = vsel %vm176_vm0, %v298_v21, -inf  ;;  %299 = vst [vmem:[%s252_s17] sm:$0x1] %v298_v21  ;;  %v52_v21 = vld [vmem:[%s749_s4 + $0x8] sm:$0xff] }
 0x6ab   :  { %303 = vmax.xlane.f32.xlu0 %v302_v22  ;;  %v459_v22 = vld [vmem:[%s746_s1] ss:$0 sm:$0xff] }
 0x738   :  { %v304_v23 = vpop.xlane.xlu0 %303 }
 0x739   :  { %v305_v24 = vrot.slane %v304_v23, 4 }
 0x73b   :  { %v306_v25 = vmax.f32 %v304_v23, %v305_v24 }
 0x73d   :  { %v307_v26 = vrot.slane %v306_v25, 2 }
 0x73f   :  { %v308_v27 = vmax.f32 %v306_v25, %v307_v26 }
 0x741   :  { %v309_v28 = vrot.slane %v308_v27, 1 }
 0x743   :  { %v310_v29 = vmax.f32 %v308_v27, %v309_v28 }
 0x745   :  { %485 = vpush %v310_v29 }
 0x776   :  { %s486_s22 = spop %485 }
 0x777   :  { %v312_v31 = vstv %s486_s22 }
 0x778   :  { %v622_v32 = vsel %vm301_vm1, %v312_v31, %v601_v50  ;;  %vm31_vm1 = vcmask 7168  }
 0x779   :  { %487 = vpush %v622_v32 }
 0x7aa   :  { %s488_s23 = spop %487 }
 0x7ab   :  { %v315_v33 = vstv %s488_s23 }
 0x7ac   :  { %vm316_vm2 = vcmp.eq.f32.partialorder %v622_v32, %v315_v33  ;;  %v461_v33 = vld [vmem:[%s748_s3] ss:$0 sm:$0xff] }
 0x7ad   :  { %v317_v34 = vsel %vm316_vm2, %v579_v5, 1 }
 0x7ae   :  { %489 = vpush %v317_v34 }
 0x7df   :  { %s627_s24 = spop %489 }
 0x7e0   :  { %s319_s25 = scalar_lea.vmem [#allocation4], %s627_s24  ;;  %s465_s28 = sshll.u32 %s627_s24, 7  ;;  %v367_v13 = vstv %s627_s24 }
 0x7e1   :  { %v320_v35 = vld [vmem:[%s319_s25] sm:$0x1]  ;;  %vm368_vm9 = vcmp.eq.s32.totalorder %v579_v5, %v367_v13 }
 0x7e2   :  { %v321_v36 = vsel %vm176_vm0, %v320_v35, -inf }
 0x7e3   :  { %322 = vmax.xlane.f32.xlu1 %v321_v36 }
 0x870   :  { %v323_v37 = vpop.xlane.xlu1 %322 }
 0x871   :  { %v324_v38 = vrot.slane %v323_v37, 4 }
 0x873   :  { %v325_v39 = vmax.f32 %v323_v37, %v324_v38 }
 0x875   :  { %v326_v40 = vrot.slane %v325_v39, 2 }
 0x877   :  { %v327_v41 = vmax.f32 %v325_v39, %v326_v40 }
 0x879   :  { %v328_v42 = vrot.slane %v327_v41, 1 }
 0x87b   :  { %v329_v43 = vmax.f32 %v327_v41, %v328_v42 }
 0x87d   :  { %491 = vpush %v329_v43 }
 0x8ae   :  { %s492_s26 = spop %491 }
 0x8af   :  { %v331_v44 = vstv %s492_s26 }
 0x8b0   :  { %vm332_vm3 = vcmp.eq.f32.partialorder %v320_v35, %v331_v44 }
 0x8b1   :  { %v333_v45 = vsel %vm332_vm3, %v589_v17, 128 }
 0x8b2   :  { %v334_v46 = vsel %vm176_vm0, %v333_v45, 2147483647 }
 0x8b3   :  { %v336_v47 = vshra.s32 %v334_v46, 16  ;;  %v335_v49 = vand.u32 65535, %v334_v46 }
 0x8b5   :  { %v338_v48 = vcvt.s32.f32 %v336_v47  ;;  %v337_v51 = vcvt.s32.f32 %v335_v49 }
 0x8b7   :  { %339 = vmin.xlane.f32.xlu0 %v338_v48 }
 0x944   :  { %v340_v50 = vpop.xlane.xlu0 %339 }
 0x945   :  { %vm341_vm4 = vcmp.eq.f32.partialorder %v338_v48, %v340_v50  ;;  %v346_v53 = vcvt.f32.s32 %v340_v50 }
 0x946   :  { %v342_v52 = vsel %vm341_vm4, %v337_v51, inf }
 0x947   :  { %343 = vmin.xlane.f32.xlu1 %v342_v52  ;;  %v347_v55 = vshll.u32 %v346_v53, 16  ;;  %v524_v52 = vmov 4294967295  }
 0x948   :  { %32 = vst.msk [vmem:[#allocation2] sm:$0xff] %vm31_vm1, %v524_v52  ;;  %33 = vst.msk [vmem:[#allocation2 + $0x8] sm:$0xff] %vm31_vm1, %v524_v52 }
 0x949   :  { %34 = vst.msk [vmem:[#allocation3] sm:$0xff] %vm31_vm1, %v524_v52 }
 0x9d4   :  { %v344_v54 = vpop.xlane.xlu1 %343 }
 0x9d5   :  { %v345_v56 = vcvt.f32.s32 %v344_v54 }
 0x9d7   :  { %v348_v57 = vadd.s32 %v347_v55, %v345_v56 }
 0x9d9   :  { %v349_v58 = vrot.slane %v348_v57, 4 }
 0x9db   :  { %vm350_vm5 = vcmp.lt.s32.totalorder %v348_v57, %v349_v58 }
 0x9dc   :  { %v351_v59 = vsel %vm350_vm5, %v348_v57, %v349_v58 }
 0x9dd   :  { %v352_v60 = vrot.slane %v351_v59, 2 }
 0x9df   :  { %vm353_vm6 = vcmp.lt.s32.totalorder %v351_v59, %v352_v60 }
 0x9e0   :  { %v354_v61 = vsel %vm353_vm6, %v351_v59, %v352_v60 }
 0x9e1   :  { %v355_v62 = vrot.slane %v354_v61, 1 }
 0x9e3   :  { %vm356_vm7 = vcmp.lt.s32.totalorder %v354_v61, %v355_v62 }
 0x9e4   :  { %v357_v63 = vsel %vm356_vm7, %v354_v61, %v355_v62 }
 0x9e5   :  { %493 = vpush %v357_v63 }
 0xa16   :  { %s494_s27 = spop %493 }
 0xa17   :  { %s360_s29 = sadd.s32 %s494_s27, %s465_s28  ;;  %v363_v0 = vstv %s494_s27 }
 0xa18   :  { %362 = sst [smem:[#allocation5 + $0x2]] %s360_s29  ;;  %vm364_vm8 = vcmp.eq.s32.totalorder %v589_v17, %v363_v0 }
 0xa19   :  { %v365_v1 = vsel %vm364_vm8, -inf, %v320_v35 }
 0xa1a   :  { %v369_v2 = vsel %vm176_vm0, %v365_v1, -inf  ;;  %366 = vst [vmem:[%s319_s25] sm:$0x1] %v365_v1 }
 0xa1b   :  { %370 = vmax.xlane.f32.xlu0 %v369_v2 }
 0xa31   :  { %54 = vperm.xlu0 %509, %v51_v3  }
 0xaa8   :  { %v371_v6 = vpop.xlane.xlu0 %370 }
 0xaa9   :  { %v372_v7 = vrot.slane %v371_v6, 4 }
 0xaab   :  { %v373_v8 = vmax.f32 %v371_v6, %v372_v7  ;;  %v109_v6 = vld [vmem:[#allocation2] sm:$0xff] }
 0xaad   :  { %v374_v9 = vrot.slane %v373_v8, 2 }
 0xaaf   :  { %v375_v10 = vmax.f32 %v373_v8, %v374_v9  ;;  %v460_v8 = vld [vmem:[%s745_s0] ss:$0 sm:$0xff] }
 0xab0   :  { %v55_v23 = vpop.permute.xlu0 %54 }
 0xab1   :  { %v376_v11 = vrot.slane %v375_v10, 1  ;;  %vm63_vm11 = vcmp.eq.s32.totalorder %v55_v23, %v459_v22 }
 0xab2   :  { %v65_v24 = vsel %vm63_vm11, %v589_v17, 4294967295 }
 0xab3   :  { %v377_v12 = vmax.f32 %v375_v10, %v376_v11  ;;  %v68_v25 = vshra.s32 %v65_v24, 16  ;;  %v67_v47 = vand.u32 65535, %v65_v24  ;;  %v525_v11 = vmov 0.0  }
 0xab4   :  { %35 = vst.msk [vmem:[%s752_s7] sm:$0xff] %vm31_vm1, %v525_v11  ;;  %36 = vst.msk [vmem:[%s752_s7 + $0x8] sm:$0xff] %vm31_vm1, %v525_v11 }
 0xab5   :  { %495 = vpush %v377_v12  ;;  %v70_v26 = vcvt.s32.f32 %v68_v25  ;;  %v69_v50 = vcvt.s32.f32 %v67_v47  ;;  %v162_v25 = vld [vmem:[#allocation3] sm:$0xff] }
 0xab6   :  { %37 = vst.msk [vmem:[%s753_s8] sm:$0xff] %vm31_vm1, %v525_v11 }
 0xae6   :  { %s496_s10 = spop %495 }
 0xae7   :  { %v379_v14 = vstv %s496_s10 }
 0xae8   :  { %v380_v15 = vsel %vm368_vm9, %v379_v14, %v622_v32 }
 0xae9   :  { %497 = vpush %v380_v15 }
 0xb1a   :  { %s498_s11 = spop %497 }
 0xb1b   :  { %v382_v16 = vstv %s498_s11 }
 0xb1c   :  { %vm383_vm10 = vcmp.eq.f32.partialorder %v380_v15, %v382_v16 }
 0xb1d   :  { %v384_v18 = vsel %vm383_vm10, %v579_v5, 1  ;;  %v128_v5 = vld [vmem:[%s750_s5] sm:$0xff] }
 0xb1e   :  { %499 = vpush %v384_v18  ;;  %v110_v18 = vld [vmem:[#allocation2 + $0x8] sm:$0xff] }
 0xb4f   :  { %s647_s12 = spop %499 }
 0xb50   :  { %s386_s13 = scalar_lea.vmem [#allocation4], %s647_s12  ;;  %s466_s9 = sshll.u32 %s647_s12, 7 }
 0xb51   :  { %v652_v19 = vld [vmem:[%s386_s13] sm:$0x1] }
 0xb52   :  { %v388_v20 = vsel %vm176_vm0, %v652_v19, -inf }
 0xb53   :  { %389 = vmax.xlane.f32.xlu1 %v388_v20 }
 0xb64   :  { %57 = vperm.xlu1 %510, %v52_v21  }
 0xb68   :  { %130 = vperm.xlu1 %510, %v128_v5  }
 0xb8c   :  { %71 = vmax.xlane.f32.xlu1 %v70_v26 }
 0xbe0   :  { %v390_v27 = vpop.xlane.xlu1 %389 }
 0xbe1   :  { %v391_v28 = vrot.slane %v390_v27, 4 }
 0xbe3   :  { %v392_v29 = vmax.f32 %v390_v27, %v391_v28  ;;  %v462_v27 = vld [vmem:[%s747_s2] ss:$0 sm:$0xff] }
 0xbe4   :  { %v58_v30 = vpop.permute.xlu1 %57 }
 0xbe5   :  { %v393_v31 = vrot.slane %v392_v29, 2  ;;  %vm64_vm12 = vcmp.eq.s32.totalorder %v58_v30, %v459_v22 }
 0xbe6   :  { %v66_v32 = vsel %vm64_vm12, %v589_v17, 4294967295 }
 0xbe7   :  { %v82_v34 = vshra.s32 %v66_v32, 16  ;;  %v394_v35 = vmax.f32 %v392_v29, %v393_v31  ;;  %v81_v53 = vand.u32 65535, %v66_v32 }
 0xbe8   :  { %v131_v36 = vpop.permute.xlu1 %130 }
 0xbe9   :  { %vm136_vm13 = vcmp.eq.s32.totalorder %v131_v36, %v461_v33  ;;  %v84_v37 = vcvt.s32.f32 %v82_v34  ;;  %v395_v38 = vrot.slane %v394_v35, 1  ;;  %v83_v56 = vcvt.s32.f32 %v81_v53  ;;  %v113_v36 = vld [vmem:[%s752_s7] sm:$0xff] }
 0xbea   :  { %v137_v39 = vsel %vm136_vm13, %v589_v17, 4294967295 }
 0xbeb   :  { %85 = vmax.xlane.f32.xlu0 %v84_v37  ;;  %v396_v40 = vmax.f32 %v394_v35, %v395_v38  ;;  %v139_v41 = vshra.s32 %v137_v39, 16  ;;  %v138_v54 = vand.u32 65535, %v137_v39 }
 0xbed   :  { %501 = vpush %v396_v40  ;;  %v141_v42 = vcvt.s32.f32 %v139_v41  ;;  %v140_v59 = vcvt.s32.f32 %v138_v54 }
 0xbef   :  { %142 = vmax.xlane.f32.xlu1 %v141_v42 }
 0xc19   :  { %v72_v48 = vpop.xlane.xlu1 %71 }
 0xc1a   :  { %vm73_vm15 = vcmp.eq.f32.partialorder %v70_v26, %v72_v48  ;;  %v78_v0 = vcvt.f32.s32 %v72_v48 }
 0xc1b   :  { %v74_v51 = vsel %vm73_vm15, %v69_v50, -inf }
 0xc1c   :  { %v79_v3 = vshll.u32 %v78_v0, 16 }
 0xc1e   :  { %s502_s1 = spop %501 }
 0xc1f   :  { %v398_v43 = vstv %s502_s1 }
 0xc20   :  { %vm399_vm14 = vcmp.eq.f32.partialorder %v652_v19, %v398_v43 }
 0xc21   :  { %v400_v44 = vsel %vm399_vm14, %v589_v17, 128 }
 0xc22   :  { %v401_v45 = vsel %vm176_vm0, %v400_v44, 2147483647 }
 0xc23   :  { %v403_v46 = vshra.s32 %v401_v45, 16  ;;  %v402_v61 = vand.u32 65535, %v401_v45 }
 0xc25   :  { %v405_v49 = vcvt.s32.f32 %v403_v46  ;;  %v404_v63 = vcvt.s32.f32 %v402_v61 }
 0xc27   :  { %406 = vmin.xlane.f32.xlu1 %v405_v49 }
 0xc2b   :  { %75 = vmax.xlane.f32.xlu1 %v74_v51 }
 0xc78   :  { %v86_v55 = vpop.xlane.xlu0 %85 }
 0xc79   :  { %vm87_vm0 = vcmp.eq.f32.partialorder %v84_v37, %v86_v55  ;;  %v92_v12 = vcvt.f32.s32 %v86_v55 }
 0xc7a   :  { %v88_v57 = vsel %vm87_vm0, %v83_v56, -inf }
 0xc7b   :  { %89 = vmax.xlane.f32.xlu1 %v88_v57  ;;  %v93_v14 = vshll.u32 %v92_v12, 16 }
 0xc7c   :  { %v143_v58 = vpop.xlane.xlu1 %142 }
 0xc7d   :  { %vm144_vm2 = vcmp.eq.f32.partialorder %v141_v42, %v143_v58  ;;  %v149_v15 = vcvt.f32.s32 %v143_v58 }
 0xc7e   :  { %v145_v60 = vsel %vm144_vm2, %v140_v59, -inf }
 0xc7f   :  { %146 = vmax.xlane.f32.xlu1 %v145_v60  ;;  %v150_v5 = vshll.u32 %v149_v15, 16 }
 0xcb4   :  { %v407_v62 = vpop.xlane.xlu1 %406 }
 0xcb5   :  { %vm408_vm3 = vcmp.eq.f32.partialorder %v405_v49, %v407_v62  ;;  %v413_v30 = vcvt.f32.s32 %v407_v62 }
 0xcb6   :  { %v409_v1 = vsel %vm408_vm3, %v404_v63, inf }
 0xcb7   :  { %410 = vmin.xlane.f32.xlu0 %v409_v1  ;;  %v414_v32 = vshll.u32 %v413_v30, 16 }
 0xcb8   :  { %v76_v2 = vpop.xlane.xlu1 %75 }
 0xcb9   :  { %v77_v4 = vcvt.f32.s32 %v76_v2 }
 0xcbb   :  { %v80_v7 = vadd.s32 %v79_v3, %v77_v4 }
 0xcbd   :  { %vm95_vm4 = vcmp.eq.s32.totalorder %v589_v17, %v80_v7  ;;  %vm111_vm5 = vcmp.gt.s32.totalorder %v80_v7, %v109_v6 }
 0xcbe   :  { %v103_v9 = vsel %vm95_vm4, %v460_v8, 0.0  ;;  %v122_v10 = vsel %vm111_vm5, %v80_v7, %v109_v6 }
 0xcbf   :  { %105 = vadd.xlane.f32.xlu1 %v103_v9  ;;  %124 = vst.msk [vmem:[#allocation2] sm:$0xff] %vm31_vm1, %v122_v10 }
 0xd08   :  { %v90_v13 = vpop.xlane.xlu1 %89 }
 0xd09   :  { %v91_v16 = vcvt.f32.s32 %v90_v13 }
 0xd0b   :  { %v94_v20 = vadd.s32 %v93_v14, %v91_v16 }
 0xd0c   :  { %v147_v21 = vpop.xlane.xlu1 %146 }
 0xd0d   :  { %v148_v22 = vcvt.f32.s32 %v147_v21  ;;  %vm96_vm6 = vcmp.eq.s32.totalorder %v589_v17, %v94_v20  ;;  %vm112_vm7 = vcmp.gt.s32.totalorder %v94_v20, %v110_v18 }
 0xd0e   :  { %v104_v23 = vsel %vm96_vm6, %v460_v8, 0.0  ;;  %v123_v24 = vsel %vm112_vm7, %v94_v20, %v110_v18 }
 0xd0f   :  { %v151_v26 = vadd.s32 %v150_v5, %v148_v22  ;;  %107 = vadd.xlane.f32.xlu0 %v104_v23  ;;  %125 = vst.msk [vmem:[#allocation2 + $0x8] sm:$0xff] %vm31_vm1, %v123_v24 }
 0xd11   :  { %vm152_vm8 = vcmp.eq.s32.totalorder %v589_v17, %v151_v26  ;;  %vm163_vm9 = vcmp.gt.s32.totalorder %v151_v26, %v162_v25 }
 0xd12   :  { %v159_v28 = vsel %vm152_vm8, %v462_v27, 0.0  ;;  %v168_v29 = vsel %vm163_vm9, %v151_v26, %v162_v25 }
 0xd13   :  { %160 = vadd.xlane.f32.xlu1 %v159_v28  ;;  %169 = vst.msk [vmem:[#allocation3] sm:$0xff] %vm31_vm1, %v168_v29 }
 0xd44   :  { %v411_v31 = vpop.xlane.xlu0 %410 }
 0xd45   :  { %v412_v33 = vcvt.f32.s32 %v411_v31 }
 0xd47   :  { %v415_v34 = vadd.s32 %v414_v32, %v412_v33 }
 0xd49   :  { %v416_v35 = vrot.slane %v415_v34, 4 }
 0xd4b   :  { %vm417_vm10 = vcmp.lt.s32.totalorder %v415_v34, %v416_v35 }
 0xd4c   :  { %v106_v37 = vpop.xlane.xlu1 %105  ;;  %v418_v38 = vsel %vm417_vm10, %v415_v34, %v416_v35 }
 0xd4d   :  { %v115_v39 = vsel %vm111_vm5, %v106_v37, %v113_v36  ;;  %v419_v40 = vrot.slane %v418_v38, 2 }
 0xd4e   :  { %118 = vst.msk [vmem:[%s752_s7] sm:$0xff] %vm31_vm1, %v115_v39 }
 0xd4f   :  { %vm420_vm11 = vcmp.lt.s32.totalorder %v418_v38, %v419_v40 }
 0xd50   :  { %v421_v41 = vsel %vm420_vm11, %v418_v38, %v419_v40 }
 0xd51   :  { %v422_v42 = vrot.slane %v421_v41, 1 }
 0xd53   :  { %vm423_vm12 = vcmp.lt.s32.totalorder %v421_v41, %v422_v42 }
 0xd54   :  { %v424_v43 = vsel %vm423_vm12, %v421_v41, %v422_v42 }
 0xd55   :  { %503 = vpush %v424_v43 }
 0xd86   :  { %s504_s10 = spop %503 }
 0xd87   :  { %s427_s11 = sadd.s32 %s504_s10, %s466_s9  ;;  %v430_v44 = vstv %s504_s10 }
 0xd88   :  { %429 = sst [smem:[#allocation5 + $0x3]] %s427_s11  ;;  %vm431_vm13 = vcmp.eq.s32.totalorder %v589_v17, %v430_v44 }
 0xd89   :  { %v432_v45 = vsel %vm431_vm13, -inf, %v652_v19 }
 0xd8a   :  { %520 = shalt.err (!%p517_p2)
}
 0xd8b   :  { %s526_s5 = smov [#allocation5]   ;;  %433 = vst [vmem:[%s386_s13] sm:$0x1] %v432_v45  ;;  %v114_v17 = vld [vmem:[%s752_s7 + $0x8] sm:$0xff]  ;;  %v164_v47 = vld [vmem:[%s753_s8] sm:$0xff] }
 0xd8c   :  { %441 = dma.smem_to_hbm %s526_s5, 16, %s751_s6, [#allocation6]  }
 0xd9c   :  { %v108_v19 = vpop.xlane.xlu0 %107 }
 0xd9d   :  { %v116_v46 = vsel %vm112_vm7, %v108_v19, %v114_v17 }
 0xd9e   :  { %119 = vst.msk [vmem:[%s752_s7 + $0x8] sm:$0xff] %vm31_vm1, %v116_v46 }
 0xda0   :  { %v161_v48 = vpop.xlane.xlu1 %160 }
 0xda1   :  { %v165_v49 = vsel %vm163_vm9, %v161_v48, %v164_v47 }
 0xda2   :  { %166 = vst.msk [vmem:[%s753_s8] sm:$0xff] %vm31_vm1, %v165_v49 }
 0xda3   :  { %521 = dma.done.wait [#allocation6], 16  }
 0xda4   :  { %522 = vsyncadd [#allocation6], 4294967280 }
 0xda5   :  { %453 = sfence }
 0xda6   :  { %454 = vsyncpa [#allocation6], 1 }

</bundles_post_ra>
